<compile_context>
chip_gen: v7x
topology: tpu7x:2x2x1
jax: 0.10.0
libtpu: 0.0.40
codegen_flags: <defaults>
</compile_context>

<pallas_src>
import jax
import jax.numpy as jnp
from jax.experimental import pallas as pl
from jax.experimental.pallas import tpu as pltpu

# ---- module constants (from the PyTorch script) ----------------------------
DIM = 4                  # MLP(dim=4, w=256, time_varying=True)
W_HIDDEN = 256
IN_DIM = DIM + 1         # cat([xt, xt, t]) -> 2 + 2 + 1 = 5
OUT_DIM = DIM            # predictions: (N, 4); [:, :2] velocity, [:, 2:] head
SIGMA = 0.2
GAMMA1 = 0.5
GAMMA2 = 0.5

F_PAD = 128              # lane padding for the layer-4 weight (full MXU pass)
TILE_M_MAX = 2048        # batch tile (rows)
SPLIT_MIN = 512          # force >= 2 tiles once batch is big enough (v7x 2 TCs)

SELU_ALPHA = 1.6732632423543772
SELU_SCALE = 1.0507009873554805


def _round_up(x, m):
    return (x + m - 1) // m * m


def _selu_unscaled(x):
    # SELU with the 1.0507 scale folded into the NEXT layer's weights.
    # exp is unguarded: the overflowed branch is discarded by the select
    # (forward-only; not safe to differentiate through).
    return jnp.where(x > 0.0, x, SELU_ALPHA * (jnp.exp(x) - 1.0))


def _custom_net_kernel(a_ref, xt_ref,
                       w1a_ref, w1b_ref, b1_ref,
                       w2_ref, b2_ref, w3_ref, b3_ref,
                       w4_ref, b4_ref,
                       o_ref):
    # out = pred_eff + b4_eff - A*xt, with the A/B/C interpolant coefficients
    # already folded into w4_eff / b4_eff by the wrapper; only A is needed here.
    A = a_ref[0]
    xt = xt_ref[...]                                   # (TM, 2) f32, narrow

    # layer 1: cat([xt, xt, t]) @ w1 + b1 folded into two broadcast FMAs
    # over the 2 valid columns plus a time-adjusted bias (b1_eff = b1 + t*w1[4]).
    z = (xt[:, 0:1] * w1a_ref[...]
         + xt[:, 1:2] * w1b_ref[...]
         + b1_ref[...])                                # (TM, 256) f32
    h = _selu_unscaled(z)

    # hidden layers: bf16 operands on the MXU, f32 accumulate, f32 epilogue
    h = _selu_unscaled(jnp.dot(h.astype(jnp.bfloat16), w2_ref[...],
                               preferred_element_type=jnp.float32) + b2_ref[...])
    h = _selu_unscaled(jnp.dot(h.astype(jnp.bfloat16), w3_ref[...],
                               preferred_element_type=jnp.float32) + b3_ref[...])

    # layer 4 fused with the interpolant tail; w4_eff/b4_eff were folded and
    # bf16-cast once per call in the wrapper. Lanes 0,1 of pred are valid.
    pred = jnp.dot(h.astype(jnp.bfloat16), w4_ref[...],
                   preferred_element_type=jnp.float32)     # (TM, 128)
    o_ref[...] = pred[:, :2] + b4_ref[...] - A * xt


# ---- parameters -------------------------------------------------------------
def init_params(key):
    """Deterministic PyTorch-Linear-style init (uniform +/- 1/sqrt(fan_in))."""
    ks = jax.random.split(key, 8)

    def lin(kw, kb, fan_in, fan_out):
        bound = 1.0 / jnp.sqrt(fan_in)
        w = jax.random.uniform(kw, (fan_in, fan_out), jnp.float32, -bound, bound)
        b = jax.random.uniform(kb, (1, fan_out), jnp.float32, -bound, bound)
        return w, b

    w1, b1 = lin(ks[0], ks[1], IN_DIM, W_HIDDEN)
    w2, b2 = lin(ks[2], ks[3], W_HIDDEN, W_HIDDEN)
    w3, b3 = lin(ks[4], ks[5], W_HIDDEN, W_HIDDEN)
    w4, b4 = lin(ks[6], ks[7], W_HIDDEN, OUT_DIM)
    return (w1, b1, w2, b2, w3, b3, w4, b4)


def prepare_params(params):
    """One-time (hoisted) folding / scaling / bf16 casting of the weights."""
    w1, b1, w2, b2, w3, b3, w4, b4 = params
    w1_eff = w1[:2] + w1[2:4]                        # fold cat([xt, xt, .])
    w4s = SELU_SCALE * w4                            # SELU scale of layer-3 output
    return {
        "w1a": w1_eff[0:1],                          # (1, 256)
        "w1b": w1_eff[1:2],                          # (1, 256)
        "w1t": w1[4:5],                              # (1, 256) row for the t column
        "b1": b1,
        # SELU scale of the previous layer's output folded into w2 / w3 / w4
        "w2": (SELU_SCALE * w2).astype(jnp.bfloat16), "b2": b2,
        "w3": (SELU_SCALE * w3).astype(jnp.bfloat16), "b3": b3,
        "w4v": jnp.zeros((W_HIDDEN, F_PAD), jnp.float32).at[:, :2].set(w4s[:, :2]),
        "w4h": jnp.zeros((W_HIDDEN, F_PAD), jnp.float32).at[:, :2].set(w4s[:, 2:4]),
        "b4v": b4[:, :2],                            # (1, 2)
        "b4h": b4[:, 2:4],                           # (1, 2)
    }


# ---- tiling ------------------------------------------------------------------
def _tiling(n):
    n_tiles = max(1, -(-n // TILE_M_MAX))
    if n >= SPLIT_MIN:
        n_tiles = max(2, n_tiles)
        n_tiles += n_tiles % 2          # even tile count -> balanced v7x cores
    tile_m = _round_up(-(-n // n_tiles), 8)   # tiles divide the batch evenly
    return tile_m, tile_m * n_tiles, n_tiles


# ---- forward ----------------------------------------------------------------
def custom_net_forward(t, xt, prep):
    """t: scalar, xt: (N, 2) f32, prep: prepare_params(...) -> (N, 2) f32."""
    N = xt.shape[0]
    tile_m, n_pad, n_tiles = _tiling(N)

    # scalar coefficient math (handles t==0 / t==1 without wide selects)
    t = jnp.asarray(t, jnp.float32)
    sigma_t2 = (SIGMA * SIGMA) * t * (1.0 - t)
    is_one = t == 1.0
    inv_1mt = 1.0 / jnp.where(is_one, 1.0, 1.0 - t)
    A = jnp.where(is_one, 100.0,
                  jnp.sqrt(1.0 - (GAMMA1 + GAMMA2) * sigma_t2) * inv_1mt)
    B = 0.5 * (2.0 * GAMMA1 - 1.0) * sigma_t2
    C = GAMMA2 * sigma_t2

    # per-call (not per-tile) folds -- all tiny
    b1_eff = prep["b1"] + t * prep["w1t"]                                # (1, 256)
    w4_eff = (A * prep["w4v"] + B * prep["w4h"]).astype(jnp.bfloat16)    # (256, 128)
    b4_eff = A * prep["b4v"] + B * prep["b4h"] + C                       # (1, 2)
    a_arr = jnp.reshape(A, (1,)).astype(jnp.float32)

    xt = xt.astype(jnp.float32)
    xt_in = xt if n_pad == N else (
        jnp.zeros((n_pad, 2), jnp.float32).at[:N].set(xt))

    def res(shape):  # weights stay resident across the batch grid
        return pl.BlockSpec(shape, lambda i: (0, 0))

    out = pl.pallas_call(
        _custom_net_kernel,
        out_shape=jax.ShapeDtypeStruct((n_pad, 2), jnp.float32),
        grid=(n_tiles,),
        in_specs=[
            pl.BlockSpec(memory_space=pltpu.MemorySpace.SMEM),  # A scalar (1,)
            pl.BlockSpec((tile_m, 2), lambda i: (i, 0)),        # xt tile (narrow)
            res((1, W_HIDDEN)),                                 # w1a
            res((1, W_HIDDEN)),                                 # w1b
            res((1, W_HIDDEN)),                                 # b1_eff
            res((W_HIDDEN, W_HIDDEN)),                          # w2 (bf16, scaled)
            res((1, W_HIDDEN)),                                 # b2
            res((W_HIDDEN, W_HIDDEN)),                          # w3 (bf16, scaled)
            res((1, W_HIDDEN)),                                 # b3
            res((W_HIDDEN, F_PAD)),                             # w4_eff (bf16)
            res((1, 2)),                                        # b4_eff
        ],
        out_specs=pl.BlockSpec((tile_m, 2), lambda i: (i, 0)),
        compiler_params=pltpu.CompilerParams(
            dimension_semantics=("parallel",),
            vmem_limit_bytes=32 * 1024 * 1024),
    )(a_arr, xt_in,
      prep["w1a"], prep["w1b"], b1_eff,
      prep["w2"], prep["b2"], prep["w3"], prep["b3"],
      w4_eff, b4_eff)

    return out if n_pad == N else out[:N]


# ---- pure-JAX reference (matches the PyTorch forward) -----------------------
def reference_forward(t, xt, params):
    w1, b1, w2, b2, w3, b3, w4, b4 = params
    tf = float(t)
    N = xt.shape[0]
    t_col = jnp.full((N, 1), tf, jnp.float32)
    x = jnp.concatenate([xt, xt, t_col], axis=-1)

    def selu(v):
        return SELU_SCALE * jnp.where(v > 0, v, SELU_ALPHA * (jnp.exp(v) - 1.0))

    h = selu(x @ w1 + b1)
    h = selu(h @ w2 + b2)
    h = selu(h @ w3 + b3)
    pred = h @ w4 + b4

    diff = pred[:, :2] - xt
    if tf == 0.0:
        return diff
    if tf == 1.0:
        return diff / 0.01
    sigma_t2 = (SIGMA * jnp.sqrt(tf * (1.0 - tf))) ** 2
    return (jnp.sqrt(1.0 - (GAMMA1 + GAMMA2) * sigma_t2) * diff / (1.0 - tf)
            + 0.5 * (2.0 * GAMMA1 - 1.0) * pred[:, 2:] * sigma_t2
            + GAMMA2 * jnp.ones_like(xt) * sigma_t2)


if __name__ == "__main__":
    key = jax.random.PRNGKey(0)
    k_param, k_x = jax.random.split(key)

    params = init_params(k_param)
    prep = prepare_params(params)          # hoisted: folded / scaled / cast once

    N = 8
    xt = jax.random.normal(k_x, (N, 2), jnp.float32)

    fwd = jax.jit(custom_net_forward)

    # mid-trajectory plus both special-cased endpoints of the interpolant
    for t in (0.35, 0.0, 1.0):
        out = jax.block_until_ready(fwd(t, xt, prep))
        ref = reference_forward(t, xt, params)
        assert out.shape == (N, 2)
        # bf16 matmul operands (f32 accumulate) -> loose-but-meaningful tol
        assert jnp.allclose(out, ref, atol=5e-2, rtol=5e-2), (t, out, ref)

    print("KERNEL_OK")
</pallas_src>

<mosaic_0001>
module attributes {stable_mosaic.version = 11 : i64} {
  func.func @_custom_net_kernel(%arg0: i32, %arg1: memref<1xf32, #tpu.memory_space<smem>>, %arg2: memref<8x2xf32, #tpu.memory_space<vmem>>, %arg3: memref<1x256xf32, #tpu.memory_space<vmem>>, %arg4: memref<1x256xf32, #tpu.memory_space<vmem>>, %arg5: memref<1x256xf32, #tpu.memory_space<vmem>>, %arg6: memref<256x256xbf16, #tpu.memory_space<vmem>>, %arg7: memref<1x256xf32, #tpu.memory_space<vmem>>, %arg8: memref<256x256xbf16, #tpu.memory_space<vmem>>, %arg9: memref<1x256xf32, #tpu.memory_space<vmem>>, %arg10: memref<256x128xbf16, #tpu.memory_space<vmem>>, %arg11: memref<1x2xf32, #tpu.memory_space<vmem>>, %arg12: memref<8x2xf32, #tpu.memory_space<vmem>>) attributes {dimension_semantics = [#tpu.dimension_semantics<parallel>], iteration_bounds = array<i64: 1>, scalar_prefetch = 0 : i64, scratch_operands = 0 : i64, tpu.core_type = #tpu.core_type<tc>, window_params = [{transform_indices = @transform_0, window_bounds = array<i64: 1>}, {transform_indices = @transform_1, window_bounds = array<i64: 8, 2>}, {pipeline_mode = #tpu.pipeline_mode<synchronous>, transform_indices = @transform_2, window_bounds = array<i64: 1, 256>}, {pipeline_mode = #tpu.pipeline_mode<synchronous>, transform_indices = @transform_3, window_bounds = array<i64: 1, 256>}, {pipeline_mode = #tpu.pipeline_mode<synchronous>, transform_indices = @transform_4, window_bounds = array<i64: 1, 256>}, {pipeline_mode = #tpu.pipeline_mode<synchronous>, transform_indices = @transform_5, window_bounds = array<i64: 256, 256>}, {pipeline_mode = #tpu.pipeline_mode<synchronous>, transform_indices = @transform_6, window_bounds = array<i64: 1, 256>}, {pipeline_mode = #tpu.pipeline_mode<synchronous>, transform_indices = @transform_7, window_bounds = array<i64: 256, 256>}, {pipeline_mode = #tpu.pipeline_mode<synchronous>, transform_indices = @transform_8, window_bounds = array<i64: 1, 256>}, {pipeline_mode = #tpu.pipeline_mode<synchronous>, transform_indices = @transform_9, window_bounds = array<i64: 256, 128>}, {pipeline_mode = #tpu.pipeline_mode<synchronous>, transform_indices = @transform_10, window_bounds = array<i64: 1, 2>}, {transform_indices = @transform_11, window_bounds = array<i64: 8, 2>}]} {
    %c0 = arith.constant 0 : index
    %0 = memref.load %arg1[%c0] : memref<1xf32, #tpu.memory_space<smem>>
    %c0_0 = arith.constant 0 : index
    %c0_1 = arith.constant 0 : index
    %1 = vector.load %arg2[%c0_0, %c0_1] : memref<8x2xf32, #tpu.memory_space<vmem>>, vector<8x2xf32>
    %2 = vector.extract_strided_slice %1 {offsets = [0, 0], sizes = [8, 1], strides = [1, 1]} : vector<8x2xf32> to vector<8x1xf32>
    %c0_2 = arith.constant 0 : index
    %c0_3 = arith.constant 0 : index
    %3 = vector.load %arg3[%c0_2, %c0_3] : memref<1x256xf32, #tpu.memory_space<vmem>>, vector<1x256xf32>
    %4 = vector.broadcast %2 : vector<8x1xf32> to vector<8x256xf32>
    %5 = vector.broadcast %3 : vector<1x256xf32> to vector<8x256xf32>
    %6 = arith.mulf %4, %5 : vector<8x256xf32>
    %7 = vector.extract_strided_slice %1 {offsets = [0, 1], sizes = [8, 1], strides = [1, 1]} : vector<8x2xf32> to vector<8x1xf32>
    %c0_4 = arith.constant 0 : index
    %c0_5 = arith.constant 0 : index
    %8 = vector.load %arg4[%c0_4, %c0_5] : memref<1x256xf32, #tpu.memory_space<vmem>>, vector<1x256xf32>
    %9 = vector.broadcast %7 : vector<8x1xf32> to vector<8x256xf32>
    %10 = vector.broadcast %8 : vector<1x256xf32> to vector<8x256xf32>
    %11 = arith.mulf %9, %10 : vector<8x256xf32>
    %12 = arith.addf %6, %11 : vector<8x256xf32>
    %c0_6 = arith.constant 0 : index
    %c0_7 = arith.constant 0 : index
    %13 = vector.load %arg5[%c0_6, %c0_7] : memref<1x256xf32, #tpu.memory_space<vmem>>, vector<1x256xf32>
    %14 = vector.broadcast %13 : vector<1x256xf32> to vector<8x256xf32>
    %15 = arith.addf %12, %14 : vector<8x256xf32>
    %cst = arith.constant 0.000000e+00 : f32
    %16 = vector.broadcast %cst : f32 to vector<8x256xf32>
    %17 = arith.cmpf ogt, %15, %16 : vector<8x256xf32>
    %18 = math.exp %15 : vector<8x256xf32>
    %cst_8 = arith.constant 1.000000e+00 : f32
    %19 = vector.broadcast %cst_8 : f32 to vector<8x256xf32>
    %20 = arith.subf %18, %19 : vector<8x256xf32>
    %cst_9 = arith.constant 1.67326319 : f32
    %21 = vector.broadcast %cst_9 : f32 to vector<8x256xf32>
    %22 = arith.mulf %21, %20 : vector<8x256xf32>
    %23 = arith.select %17, %15, %22 : vector<8x256xi1>, vector<8x256xf32>
    %24 = arith.truncf %23 : vector<8x256xf32> to vector<8x256xbf16>
    %c0_10 = arith.constant 0 : index
    %c0_11 = arith.constant 0 : index
    %25 = vector.load %arg6[%c0_10, %c0_11] : memref<256x256xbf16, #tpu.memory_space<vmem>>, vector<256x256xbf16>
    %cst_12 = arith.constant dense<0.000000e+00> : vector<8x256xf32>
    %26 = tpu.matmul %24, %25, %cst_12 {dimension_numbers = #tpu.dot_dimension_numbers<[1], [0], [0], [1], [0, 0, 1, 1], [], []>} : vector<8x256xbf16>, vector<256x256xbf16>, vector<8x256xf32> -> vector<8x256xf32>
    %c0_13 = arith.constant 0 : index
    %c0_14 = arith.constant 0 : index
    %27 = vector.load %arg7[%c0_13, %c0_14] : memref<1x256xf32, #tpu.memory_space<vmem>>, vector<1x256xf32>
    %28 = vector.broadcast %27 : vector<1x256xf32> to vector<8x256xf32>
    %29 = arith.addf %26, %28 : vector<8x256xf32>
    %cst_15 = arith.constant 0.000000e+00 : f32
    %30 = vector.broadcast %cst_15 : f32 to vector<8x256xf32>
    %31 = arith.cmpf ogt, %29, %30 : vector<8x256xf32>
    %32 = math.exp %29 : vector<8x256xf32>
    %cst_16 = arith.constant 1.000000e+00 : f32
    %33 = vector.broadcast %cst_16 : f32 to vector<8x256xf32>
    %34 = arith.subf %32, %33 : vector<8x256xf32>
    %cst_17 = arith.constant 1.67326319 : f32
    %35 = vector.broadcast %cst_17 : f32 to vector<8x256xf32>
    %36 = arith.mulf %35, %34 : vector<8x256xf32>
    %37 = arith.select %31, %29, %36 : vector<8x256xi1>, vector<8x256xf32>
    %38 = arith.truncf %37 : vector<8x256xf32> to vector<8x256xbf16>
    %c0_18 = arith.constant 0 : index
    %c0_19 = arith.constant 0 : index
    %39 = vector.load %arg8[%c0_18, %c0_19] : memref<256x256xbf16, #tpu.memory_space<vmem>>, vector<256x256xbf16>
    %cst_20 = arith.constant dense<0.000000e+00> : vector<8x256xf32>
    %40 = tpu.matmul %38, %39, %cst_20 {dimension_numbers = #tpu.dot_dimension_numbers<[1], [0], [0], [1], [0, 0, 1, 1], [], []>} : vector<8x256xbf16>, vector<256x256xbf16>, vector<8x256xf32> -> vector<8x256xf32>
    %c0_21 = arith.constant 0 : index
    %c0_22 = arith.constant 0 : index
    %41 = vector.load %arg9[%c0_21, %c0_22] : memref<1x256xf32, #tpu.memory_space<vmem>>, vector<1x256xf32>
    %42 = vector.broadcast %41 : vector<1x256xf32> to vector<8x256xf32>
    %43 = arith.addf %40, %42 : vector<8x256xf32>
    %cst_23 = arith.constant 0.000000e+00 : f32
    %44 = vector.broadcast %cst_23 : f32 to vector<8x256xf32>
    %45 = arith.cmpf ogt, %43, %44 : vector<8x256xf32>
    %46 = math.exp %43 : vector<8x256xf32>
    %cst_24 = arith.constant 1.000000e+00 : f32
    %47 = vector.broadcast %cst_24 : f32 to vector<8x256xf32>
    %48 = arith.subf %46, %47 : vector<8x256xf32>
    %cst_25 = arith.constant 1.67326319 : f32
    %49 = vector.broadcast %cst_25 : f32 to vector<8x256xf32>
    %50 = arith.mulf %49, %48 : vector<8x256xf32>
    %51 = arith.select %45, %43, %50 : vector<8x256xi1>, vector<8x256xf32>
    %52 = arith.truncf %51 : vector<8x256xf32> to vector<8x256xbf16>
    %c0_26 = arith.constant 0 : index
    %c0_27 = arith.constant 0 : index
    %53 = vector.load %arg10[%c0_26, %c0_27] : memref<256x128xbf16, #tpu.memory_space<vmem>>, vector<256x128xbf16>
    %cst_28 = arith.constant dense<0.000000e+00> : vector<8x128xf32>
    %54 = tpu.matmul %52, %53, %cst_28 {dimension_numbers = #tpu.dot_dimension_numbers<[1], [0], [0], [1], [0, 0, 1, 1], [], []>} : vector<8x256xbf16>, vector<256x128xbf16>, vector<8x128xf32> -> vector<8x128xf32>
    %55 = vector.extract_strided_slice %54 {offsets = [0, 0], sizes = [8, 2], strides = [1, 1]} : vector<8x128xf32> to vector<8x2xf32>
    %c0_29 = arith.constant 0 : index
    %c0_30 = arith.constant 0 : index
    %56 = vector.load %arg11[%c0_29, %c0_30] : memref<1x2xf32, #tpu.memory_space<vmem>>, vector<1x2xf32>
    %57 = vector.broadcast %56 : vector<1x2xf32> to vector<8x2xf32>
    %58 = arith.addf %55, %57 : vector<8x2xf32>
    %59 = vector.broadcast %0 : f32 to vector<8x2xf32>
    %60 = arith.mulf %59, %1 : vector<8x2xf32>
    %61 = arith.subf %58, %60 : vector<8x2xf32>
    %c0_31 = arith.constant 0 : index
    %c0_32 = arith.constant 0 : index
    %62 = vector.load %arg12[%c0_31, %c0_32] : memref<8x2xf32, #tpu.memory_space<vmem>>, vector<8x2xf32>
    tpu.vector_store %arg12[%c0_31, %c0_32], %61 {strides = array<i32>} : memref<8x2xf32, #tpu.memory_space<vmem>>, vector<8x2xf32>,
    return
  }
  func.func @transform_0(%arg0: i32) -> i32 {
    %c0_i32 = arith.constant 0 : i32
    %c0_i32_0 = arith.constant 0 : i32
    return %c0_i32 : i32
  }
  func.func @transform_1(%arg0: i32) -> (i32, i32) {
    %c0_i32 = arith.constant 0 : i32
    %c0_i32_0 = arith.constant 0 : i32
    return %arg0, %c0_i32 : i32, i32
  }
  func.func @transform_2(%arg0: i32) -> (i32, i32) {
    %c0_i32 = arith.constant 0 : i32
    %c0_i32_0 = arith.constant 0 : i32
    %c0_i32_1 = arith.constant 0 : i32
    return %c0_i32, %c0_i32_0 : i32, i32
  }
  func.func @transform_3(%arg0: i32) -> (i32, i32) {
    %c0_i32 = arith.constant 0 : i32
    %c0_i32_0 = arith.constant 0 : i32
    %c0_i32_1 = arith.constant 0 : i32
    return %c0_i32, %c0_i32_0 : i32, i32
  }
  func.func @transform_4(%arg0: i32) -> (i32, i32) {
    %c0_i32 = arith.constant 0 : i32
    %c0_i32_0 = arith.constant 0 : i32
    %c0_i32_1 = arith.constant 0 : i32
    return %c0_i32, %c0_i32_0 : i32, i32
  }
  func.func @transform_5(%arg0: i32) -> (i32, i32) {
    %c0_i32 = arith.constant 0 : i32
    %c0_i32_0 = arith.constant 0 : i32
    %c0_i32_1 = arith.constant 0 : i32
    return %c0_i32, %c0_i32_0 : i32, i32
  }
  func.func @transform_6(%arg0: i32) -> (i32, i32) {
    %c0_i32 = arith.constant 0 : i32
    %c0_i32_0 = arith.constant 0 : i32
    %c0_i32_1 = arith.constant 0 : i32
    return %c0_i32, %c0_i32_0 : i32, i32
  }
  func.func @transform_7(%arg0: i32) -> (i32, i32) {
    %c0_i32 = arith.constant 0 : i32
    %c0_i32_0 = arith.constant 0 : i32
    %c0_i32_1 = arith.constant 0 : i32
    return %c0_i32, %c0_i32_0 : i32, i32
  }
  func.func @transform_8(%arg0: i32) -> (i32, i32) {
    %c0_i32 = arith.constant 0 : i32
    %c0_i32_0 = arith.constant 0 : i32
    %c0_i32_1 = arith.constant 0 : i32
    return %c0_i32, %c0_i32_0 : i32, i32
  }
  func.func @transform_9(%arg0: i32) -> (i32, i32) {
    %c0_i32 = arith.constant 0 : i32
    %c0_i32_0 = arith.constant 0 : i32
    %c0_i32_1 = arith.constant 0 : i32
    return %c0_i32, %c0_i32_0 : i32, i32
  }
  func.func @transform_10(%arg0: i32) -> (i32, i32) {
    %c0_i32 = arith.constant 0 : i32
    %c0_i32_0 = arith.constant 0 : i32
    %c0_i32_1 = arith.constant 0 : i32
    return %c0_i32, %c0_i32_0 : i32, i32
  }
  func.func @transform_11(%arg0: i32) -> (i32, i32) {
    %c0_i32 = arith.constant 0 : i32
    %c0_i32_0 = arith.constant 0 : i32
    return %arg0, %c0_i32 : i32, i32
  }
}

</mosaic_0001>

<bundles_post_ra>
// kernel: custom_net_forward.1
= control target key start
LH: loop header
LB: loop body
LE: loop exit
PB: predicated region body
PF: predicated region fallthrough
CT: control target
= control target key end

     0   :  { %v1049_v0 = vmov 0   ;;  %v1050_v6 = vmov 1   ;;  %v49_v55 = vlaneseq  ;;  %vm806_vm6 = vcmask 15360   ;;  %s1397_s1 = inlined_call_operand.vmem [shape: f32[8,2], index: 1, kind: input, shape index: {}]   ;;  %s1398_s5 = inlined_call_operand.vmem [shape: bf16[256,256], index: 5, kind: input, shape index: {}]   ;;  %s1399_s7 = inlined_call_operand.vmem [shape: bf16[256,256], index: 7, kind: input, shape index: {}]   ;;  %s1400_s2 = inlined_call_operand.vmem [shape: f32[1,256], index: 2, kind: input, shape index: {}]   ;;  %s1401_s3 = inlined_call_operand.vmem [shape: f32[1,256], index: 3, kind: input, shape index: {}]   ;;  %s1402_s4 = inlined_call_operand.vmem [shape: f32[1,256], index: 4, kind: input, shape index: {}]   ;;  %s1403_s9 = inlined_call_operand.vmem [shape: bf16[256,128], index: 9, kind: input, shape index: {}]   ;;  %s1404_s6 = inlined_call_operand.vmem [shape: f32[1,256], index: 6, kind: input, shape index: {}]   ;;  %s1405_s8 = inlined_call_operand.vmem [shape: f32[1,256], index: 8, kind: input, shape index: {}]   ;;  %s1406_s0 = inlined_call_operand.<no memory space> [shape: f32[1], index: 0, kind: input, shape index: {}]   ;;  %s1407_s10 = inlined_call_operand.vmem [shape: f32[1,2], index: 10, kind: input, shape index: {}]   ;;  %s1408_s11 = inlined_call_operand.vmem [shape: f32[8,2], index: 11, kind: output, shape index: {}]  }
   0x1   :  { %923 = vset.pattern.permute.xlu0 %v1049_v0  ;;  %v1114_v1 = vld [vmem:[%s1397_s1] sm:$0xff]  ;;  %v928_v4 = vld [vmem:[%s1398_s5 + $0x14] ss:$8 sps:$4 sm:$0xff]   ;;  %v930_v5 = vld [vmem:[%s1398_s5 + $0x10] ss:$8 sps:$4 sm:$0xff]  }
   0x2   :  { %45 = vperm.xlu0 %923, %v1114_v1   ;;  %v925_v2 = vld [vmem:[%s1398_s5 + $0x4] ss:$8 sps:$4 sm:$0xff]   ;;  %v927_v3 = vld [vmem:[%s1398_s5] ss:$8 sps:$4 sm:$0xff]   ;;  %v934_v9 = vld [vmem:[%s1398_s5 + $0x34] ss:$8 sps:$4 sm:$0xff]  }
   0x3   :  { %313 = vmatprep.subr.bf16.mxu0 %v925_v2  ;;  %v931_v7 = vld [vmem:[%s1398_s5 + $0x24] ss:$8 sps:$4 sm:$0xff]   ;;  %v933_v8 = vld [vmem:[%s1398_s5 + $0x20] ss:$8 sps:$4 sm:$0xff]   ;;  %v936_v10 = vld [vmem:[%s1398_s5 + $0x30] ss:$8 sps:$4 sm:$0xff]  }
   0x4   :  { %314 = vmatpush1.bf16.msra.mxu0 %v927_v3  ;;  %v937_v11 = vld [vmem:[%s1398_s5 + $0x44] ss:$8 sps:$4 sm:$0xff]   ;;  %v939_v12 = vld [vmem:[%s1398_s5 + $0x40] ss:$8 sps:$4 sm:$0xff]   ;;  %v940_v13 = vld [vmem:[%s1398_s5 + $0x54] ss:$8 sps:$4 sm:$0xff]  }
   0x5   :  { %315 = vmatprep.subr.bf16.mxu0 %v928_v4  ;;  %v942_v14 = vld [vmem:[%s1398_s5 + $0x50] ss:$8 sps:$4 sm:$0xff]   ;;  %v943_v15 = vld [vmem:[%s1398_s5 + $0x64] ss:$8 sps:$4 sm:$0xff]   ;;  %v945_v16 = vld [vmem:[%s1398_s5 + $0x60] ss:$8 sps:$4 sm:$0xff]  }
   0x6   :  { %924 = vset.pattern.permute.xlu0 %v1050_v6  ;;  %v946_v17 = vld [vmem:[%s1398_s5 + $0x74] ss:$8 sps:$4 sm:$0xff]   ;;  %v948_v18 = vld [vmem:[%s1398_s5 + $0x70] ss:$8 sps:$4 sm:$0xff]   ;;  %v949_v19 = vld [vmem:[%s1398_s5 + $0x84] ss:$8 sps:$4 sm:$0xff]  }
   0x7   :  { %63 = vperm.xlu0 %924, %v1114_v1   ;;  %v951_v20 = vld [vmem:[%s1398_s5 + $0x80] ss:$8 sps:$4 sm:$0xff]   ;;  %v952_v21 = vld [vmem:[%s1398_s5 + $0x94] ss:$8 sps:$4 sm:$0xff]   ;;  %v954_v22 = vld [vmem:[%s1398_s5 + $0x90] ss:$8 sps:$4 sm:$0xff]  }
   0x8   :  { %316 = vmatpush1.bf16.msra.mxu0 %v930_v5  ;;  %v973_v23 = vld [vmem:[%s1399_s7 + $0x4] ss:$8 sps:$4 sm:$0xff]   ;;  %v975_v24 = vld [vmem:[%s1399_s7] ss:$8 sps:$4 sm:$0xff]   ;;  %v976_v26 = vld [vmem:[%s1399_s7 + $0x14] ss:$8 sps:$4 sm:$0xff]  }
   0x9   :  { %317 = vmatprep.subr.bf16.mxu0 %v931_v7  ;;  %v955_v25 = vld [vmem:[%s1398_s5 + $0xa4] ss:$8 sps:$4 sm:$0xff]   ;;  %572 = vmatprep.subr.bf16.mxu1 %v973_v23  ;;  %v978_v27 = vld [vmem:[%s1399_s7 + $0x10] ss:$8 sps:$4 sm:$0xff]   ;;  %v957_v29 = vld [vmem:[%s1398_s5 + $0xa0] ss:$8 sps:$4 sm:$0xff]  }
   0xa   :  { %573 = vmatpush1.bf16.msra.mxu1 %v975_v24  ;;  %v979_v28 = vld [vmem:[%s1399_s7 + $0x24] ss:$8 sps:$4 sm:$0xff]   ;;  %v958_v30 = vld [vmem:[%s1398_s5 + $0xb4] ss:$8 sps:$4 sm:$0xff]   ;;  %v981_v31 = vld [vmem:[%s1399_s7 + $0x20] ss:$8 sps:$4 sm:$0xff]  }
   0xb   :  { %574 = vmatprep.subr.bf16.mxu1 %v976_v26  ;;  %v982_v32 = vld [vmem:[%s1399_s7 + $0x34] ss:$8 sps:$4 sm:$0xff]   ;;  %v960_v33 = vld [vmem:[%s1398_s5 + $0xb0] ss:$8 sps:$4 sm:$0xff]   ;;  %v961_v34 = vld [vmem:[%s1398_s5 + $0xc4] ss:$8 sps:$4 sm:$0xff]  }
   0xc   :  { %318 = vmatpush1.bf16.msra.mxu0 %v933_v8  ;;  %v963_v35 = vld [vmem:[%s1398_s5 + $0xc0] ss:$8 sps:$4 sm:$0xff]   ;;  %v984_v36 = vld [vmem:[%s1399_s7 + $0x30] ss:$8 sps:$4 sm:$0xff]   ;;  %v985_v37 = vld [vmem:[%s1399_s7 + $0x44] ss:$8 sps:$4 sm:$0xff]  }
   0xd   :  { %319 = vmatprep.subr.bf16.mxu0 %v934_v9  ;;  %v964_v38 = vld [vmem:[%s1398_s5 + $0xd4] ss:$8 sps:$4 sm:$0xff]   ;;  %v987_v39 = vld [vmem:[%s1399_s7 + $0x40] ss:$8 sps:$4 sm:$0xff]   ;;  %v966_v41 = vld [vmem:[%s1398_s5 + $0xd0] ss:$8 sps:$4 sm:$0xff]  }
   0xe   :  { %575 = vmatpush1.bf16.msra.mxu1 %v978_v27  ;;  %v988_v40 = vld [vmem:[%s1399_s7 + $0x54] ss:$8 sps:$4 sm:$0xff]   ;;  %v967_v42 = vld [vmem:[%s1398_s5 + $0xe4] ss:$8 sps:$4 sm:$0xff]   ;;  %v990_v43 = vld [vmem:[%s1399_s7 + $0x50] ss:$8 sps:$4 sm:$0xff]  }
   0xf   :  { %576 = vmatprep.subr.bf16.mxu1 %v979_v28  ;;  %v991_v44 = vld [vmem:[%s1399_s7 + $0x64] ss:$8 sps:$4 sm:$0xff]   ;;  %v969_v45 = vld [vmem:[%s1398_s5 + $0xe0] ss:$8 sps:$4 sm:$0xff]   ;;  %v970_v46 = vld [vmem:[%s1398_s5 + $0xf4] ss:$8 sps:$4 sm:$0xff]  }
  0x10   :  { %320 = vmatpush1.bf16.msra.mxu0 %v936_v10  ;;  %v993_v47 = vld [vmem:[%s1399_s7 + $0x60] ss:$8 sps:$4 sm:$0xff]   ;;  %v994_v48 = vld [vmem:[%s1399_s7 + $0x74] ss:$8 sps:$4 sm:$0xff]   ;;  %v972_v49 = vld [vmem:[%s1398_s5 + $0xf0] ss:$8 sps:$4 sm:$0xff]  }
  0x11   :  { %321 = vmatprep.subr.bf16.mxu0 %v937_v11  ;;  %v996_v50 = vld [vmem:[%s1399_s7 + $0x70] ss:$8 sps:$4 sm:$0xff]   ;;  %v997_v51 = vld [vmem:[%s1399_s7 + $0x84] ss:$8 sps:$4 sm:$0xff]   ;;  %v999_v52 = vld [vmem:[%s1399_s7 + $0x80] ss:$8 sps:$4 sm:$0xff]  }
  0x12   :  { %577 = vmatpush1.bf16.msra.mxu1 %v981_v31  ;;  %v1000_v53 = vld [vmem:[%s1399_s7 + $0x94] ss:$8 sps:$4 sm:$0xff]   ;;  %v1002_v54 = vld [vmem:[%s1399_s7 + $0x90] ss:$8 sps:$4 sm:$0xff]   ;;  %v50_v56 = vshrl.u32 %v49_v55, 7 }
  0x13   :  { %578 = vmatprep.subr.bf16.mxu1 %v982_v32  ;;  %v42_v59 = vld [vmem:[%s1400_s2] sm:$0x3]  ;;  %v1003_v27 = vld [vmem:[%s1399_s7 + $0xa4] ss:$8 sps:$4 sm:$0xff]  }
  0x14   :  { %322 = vmatpush1.bf16.msra.mxu0 %v939_v12  ;;  %v1274_v57 = vsub.s32 0, %v50_v56  ;;  %v1276_v58 = vsub.s32 1, %v50_v56  ;;  %v61_v60 = vld [vmem:[%s1401_s3] sm:$0x3]  ;;  %v1009_v31 = vld [vmem:[%s1399_s7 + $0xc4] ss:$8 sps:$4 sm:$0xff]  }
  0x15   :  { %323 = vmatprep.subr.bf16.mxu0 %v940_v13  ;;  %v81_v3 = vld [vmem:[%s1402_s4] sm:$0x3] }
  0x16   :  { %579 = vmatpush1.bf16.msra.mxu1 %v984_v36  ;;  %v52_v62 = vrot.slane %v42_v59, %v1274_v57  ;;  %v56_v63 = vrot.slane %v42_v59, %v1276_v58  ;;  %v70_v0 = vrot.slane %v61_v60, %v1274_v57  ;;  %v74_v2 = vrot.slane %v61_v60, %v1276_v58  ;;  %v1005_v28 = vld [vmem:[%s1399_s7 + $0xa0] ss:$8 sps:$4 sm:$0xff]  }
  0x17   :  { %580 = vmatprep.subr.bf16.mxu1 %v985_v37  ;;  %v86_v4 = vrot.slane %v81_v3, %v1274_v57  ;;  %v90_v5 = vrot.slane %v81_v3, %v1276_v58  ;;  %v1011_v32 = vld [vmem:[%s1399_s7 + $0xc0] ss:$8 sps:$4 sm:$0xff]   ;;  %v1018_v37 = vld [vmem:[%s1399_s7 + $0xf4] ss:$8 sps:$4 sm:$0xff]  }
  0x18   :  { %324 = vmatpush1.bf16.msra.mxu0 %v942_v14  ;;  %v1017_v36 = vld [vmem:[%s1399_s7 + $0xe0] ss:$8 sps:$4 sm:$0xff]   ;;  %v1025_v3 = vld [vmem:[%s1403_s9 + $0x50] sm:$0xff]  }
  0x19   :  { %325 = vmatprep.subr.bf16.mxu0 %v943_v15 }
  0x1a   :  { %581 = vmatpush1.bf16.msra.mxu1 %v987_v39  ;;  %v1021_v39 = vld [vmem:[%s1403_s9 + $0x40] sm:$0xff]  }
  0x1b   :  { %582 = vmatprep.subr.bf16.mxu1 %v988_v40  ;;  %v1022_v40 = vld [vmem:[%s1403_s9] sm:$0xff]  }
  0x1c   :  { %326 = vmatpush1.bf16.msra.mxu0 %v945_v16 }
  0x1d   :  { %327 = vmatprep.subr.bf16.mxu0 %v946_v17 }
  0x1e   :  { %583 = vmatpush1.bf16.msra.mxu1 %v990_v43  ;;  %v141_v43 = vld [vmem:[%s1404_s6] sm:$0x3] }
  0x1f   :  { %584 = vmatprep.subr.bf16.mxu1 %v991_v44  ;;  %v146_v44 = vrot.slane %v141_v43, %v1274_v57 }
  0x20   :  { %328 = vmatpush1.bf16.msra.mxu0 %v948_v18 }
  0x21   :  { %329 = vmatprep.subr.bf16.mxu0 %v949_v19 }
  0x22   :  { %585 = vmatpush1.bf16.msra.mxu1 %v993_v47 }
  0x23   :  { %586 = vmatprep.subr.bf16.mxu1 %v994_v48 }
  0x24   :  { %330 = vmatpush1.bf16.msra.mxu0 %v951_v20 }
  0x25   :  { %331 = vmatprep.subr.bf16.mxu0 %v952_v21 }
  0x26   :  { %587 = vmatpush1.bf16.msra.mxu1 %v996_v50 }
  0x27   :  { %588 = vmatprep.subr.bf16.mxu1 %v997_v51 }
  0x28   :  { %332 = vmatpush1.bf16.msra.mxu0 %v954_v22 }
  0x29   :  { %333 = vmatprep.subr.bf16.mxu0 %v955_v25 }
  0x2a   :  { %589 = vmatpush1.bf16.msra.mxu1 %v999_v52 }
  0x2b   :  { %590 = vmatprep.subr.bf16.mxu1 %v1000_v53 }
  0x2c   :  { %334 = vmatpush1.bf16.msra.mxu0 %v957_v29  ;;  %v1006_v29 = vld [vmem:[%s1399_s7 + $0xb4] ss:$8 sps:$4 sm:$0xff]  }
  0x2d   :  { %335 = vmatprep.subr.bf16.mxu0 %v958_v30  ;;  %v1008_v30 = vld [vmem:[%s1399_s7 + $0xb0] ss:$8 sps:$4 sm:$0xff]  }
  0x2e   :  { %591 = vmatpush1.bf16.msra.mxu1 %v1002_v54 }
  0x2f   :  { %592 = vmatprep.subr.bf16.mxu1 %v1003_v27 }
  0x30   :  { %336 = vmatpush1.bf16.msra.mxu0 %v960_v33  ;;  %v1012_v33 = vld [vmem:[%s1399_s7 + $0xd4] ss:$8 sps:$4 sm:$0xff]  }
  0x31   :  { %337 = vmatprep.subr.bf16.mxu0 %v961_v34  ;;  %v1014_v34 = vld [vmem:[%s1399_s7 + $0xd0] ss:$8 sps:$4 sm:$0xff]  }
  0x32   :  { %593 = vmatpush1.bf16.msra.mxu1 %v1005_v28 }
  0x33   :  { %594 = vmatprep.subr.bf16.mxu1 %v1006_v29 }
  0x34   :  { %338 = vmatpush1.bf16.msra.mxu0 %v963_v35  ;;  %v1015_v35 = vld [vmem:[%s1399_s7 + $0xe4] ss:$8 sps:$4 sm:$0xff]  }
  0x35   :  { %339 = vmatprep.subr.bf16.mxu0 %v964_v38  ;;  %v1020_v38 = vld [vmem:[%s1399_s7 + $0xf0] ss:$8 sps:$4 sm:$0xff]  }
  0x36   :  { %595 = vmatpush1.bf16.msra.mxu1 %v1008_v30 }
  0x37   :  { %596 = vmatprep.subr.bf16.mxu1 %v1009_v31 }
  0x38   :  { %340 = vmatpush1.bf16.msra.mxu0 %v966_v41  ;;  %v1023_v41 = vld [vmem:[%s1403_s9 + $0x48] sm:$0xff]  }
  0x39   :  { %341 = vmatprep.subr.bf16.mxu0 %v967_v42  ;;  %v1024_v42 = vld [vmem:[%s1403_s9 + $0x8] sm:$0xff]  }
  0x3a   :  { %597 = vmatpush1.bf16.msra.mxu1 %v1011_v32 }
  0x3b   :  { %598 = vmatprep.subr.bf16.mxu1 %v1012_v33 }
  0x3c   :  { %342 = vmatpush1.bf16.msra.mxu0 %v969_v45  ;;  %v150_v45 = vrot.slane %v141_v43, %v1276_v58 }
  0x3d   :  { %343 = vmatprep.subr.bf16.mxu0 %v970_v46 }
  0x3e   :  { %599 = vmatpush1.bf16.msra.mxu1 %v1014_v34  ;;  %v803_v34 = vstv %s1406_s0 }
  0x3f   :  { %600 = vmatprep.subr.bf16.mxu1 %v1015_v35 }
  0x40   :  { %344 = vmatpush1.bf16.msra.mxu0 %v972_v49 }
  0x41   :  { %899 = vmatprep.subr.bf16.mxu0 %v1021_v39 }
  0x42   :  { %601 = vmatpush1.bf16.msra.mxu1 %v1017_v36 }
  0x43   :  { %602 = vmatprep.subr.bf16.mxu1 %v1018_v37  ;;  %v898_v37 = vld [vmem:[%s1407_s10] ss:$0 sm:$0xff] }
  0x46   :  { %603 = vmatpush1.bf16.msra.mxu1 %v1020_v38  ;;  %v804_v38 = vmul.f32 %v803_v34, %v1114_v1 }
  0x81   :  { %v46_v61 = vpop.permute.xlu0 %45 }
  0x82   :  { %v59_v7 = vmul.f32 %v52_v62, %v46_v61  ;;  %v60_v8 = vmul.f32 %v56_v63, %v46_v61 }
  0x86   :  { %v64_v6 = vpop.permute.xlu0 %63 }
  0x87   :  { %v77_v9 = vmul.f32 %v70_v0, %v64_v6  ;;  %v78_v10 = vmul.f32 %v74_v2, %v64_v6  ;;  %v1028_v6 = vld [vmem:[%s1403_s9 + $0x18] sm:$0xff]  }
  0x89   :  { %v79_v11 = vadd.f32 %v77_v9, %v59_v7  ;;  %v80_v12 = vadd.f32 %v78_v10, %v60_v8  ;;  %v1029_v7 = vld [vmem:[%s1403_s9 + $0x60] sm:$0xff]   ;;  %v1031_v9 = vld [vmem:[%s1403_s9 + $0x68] sm:$0xff]  }
  0x8a   :  { %v1030_v8 = vld [vmem:[%s1403_s9 + $0x20] sm:$0xff]   ;;  %v1032_v10 = vld [vmem:[%s1403_s9 + $0x28] sm:$0xff]  }
  0x8b   :  { %v93_v13 = vadd.f32 %v86_v4, %v79_v11  ;;  %v94_v14 = vadd.f32 %v90_v5, %v80_v12  ;;  %v1026_v4 = vld [vmem:[%s1403_s9 + $0x10] sm:$0xff]   ;;  %v1027_v5 = vld [vmem:[%s1403_s9 + $0x58] sm:$0xff]  }
  0x8c   :  { %v1033_v11 = vld [vmem:[%s1403_s9 + $0x70] sm:$0xff]  }
  0x8d   :  { %v97_v15 = vmul.f32 1.442695, %v93_v13  ;;  %v99_v16 = vmul.f32 1.442695, %v94_v14  ;;  %vm95_vm0 = vcmp.gt.f32.partialorder %v93_v13, 0.0  ;;  %vm96_vm1 = vcmp.gt.f32.partialorder %v94_v14, 0.0 }
  0x8e   :  { %v1034_v12 = vld [vmem:[%s1403_s9 + $0x30] sm:$0xff]  }
  0x8f   :  { %1037 = vpow2.f32 %v97_v15  ;;  %v400_v15 = vld [vmem:[%s1405_s8] sm:$0x3] }
  0x90   :  { %1039 = vpow2.f32 %v99_v16  ;;  %v405_v16 = vrot.slane %v400_v15, %v1274_v57 }
  0x99   :  { %v1038_v17 = vpop.eup %1037 }
  0x9a   :  { %v1040_v18 = vpop.eup %1039  ;;  %v812_v19 = vadd.f32 -1.0, %v1038_v17  ;;  %v409_v17 = vrot.slane %v400_v15, %v1276_v58 }
  0x9b   :  { %v813_v20 = vadd.f32 -1.0, %v1040_v18 }
  0x9c   :  { %v103_v21 = vmul.f32 1.6732632, %v812_v19 }
  0x9d   :  { %v104_v22 = vmul.f32 1.6732632, %v813_v20 }
  0x9e   :  { %v105_v23 = vsel %vm95_vm0, %v93_v13, %v103_v21  ;;  %v1035_v13 = vld [vmem:[%s1403_s9 + $0x78] sm:$0xff]  }
  0x9f   :  { %v106_v24 = vsel %vm96_vm1, %v94_v14, %v104_v22  ;;  %v107_v25 = vpack.c.bf16 %v105_v23, %v105_v23  ;;  %v1036_v14 = vld [vmem:[%s1403_s9 + $0x38] sm:$0xff]  }
  0xa0   :  { %v108_v26 = vpack.c.bf16 %v106_v24, %v106_v24 }
  0xa2   :  { %345 = vmatprep.mubr.bf16.mxu0 %v108_v26 }
  0xa3   :  { %346 = vmatmul.mubr.bf16.vlgmr.msra.gmra.mrb[0].mxu0 %v107_v25 }
  0xa4   :  { %900 = vmatpush3.bf16.msra.mxu0 %v1022_v40 }
  0xa5   :  { %901 = vmatprep.subr.bf16.mxu0 %v1023_v41 }
  0xa8   :  { %902 = vmatpush3.bf16.msra.mxu0 %v1024_v42 }
  0xa9   :  { %903 = vmatprep.subr.bf16.mxu0 %v1025_v3 }
  0xac   :  { %904 = vmatpush3.bf16.msra.mxu0 %v1026_v4 }
  0xad   :  { %905 = vmatprep.subr.bf16.mxu0 %v1027_v5 }
  0xb0   :  { %906 = vmatpush3.bf16.msra.mxu0 %v1028_v6 }
  0xb1   :  { %907 = vmatprep.subr.bf16.mxu0 %v1029_v7 }
  0xb4   :  { %908 = vmatpush3.bf16.msra.mxu0 %v1030_v8 }
  0xb5   :  { %909 = vmatprep.subr.bf16.mxu0 %v1031_v9 }
  0xb8   :  { %910 = vmatpush3.bf16.msra.mxu0 %v1032_v10 }
  0xb9   :  { %911 = vmatprep.subr.bf16.mxu0 %v1033_v11 }
  0xbc   :  { %912 = vmatpush3.bf16.msra.mxu0 %v1034_v12 }
  0xbd   :  { %913 = vmatprep.subr.bf16.mxu0 %v1035_v13 }
  0xc0   :  { %914 = vmatpush3.bf16.msra.mxu0 %v1036_v14 }
 0x176   :  { %v347_v46 = vpop.f32.mrb[0].mxu0 }
 0x177   :  { %v348_v47 = vadd.f32 %v347_v46, %v146_v44  ;;  %v349_v48 = vpop.f32.mrb[1].mxu0 }
 0x178   :  { %v350_v49 = vadd.f32 %v349_v48, %v150_v45  ;;  %v351_v50 = vpop.f32.mrb[2].mxu0 }
 0x179   :  { %v356_v51 = vmul.f32 1.442695, %v348_v47  ;;  %v352_v52 = vpop.f32.mrb[3].mxu0  ;;  %vm354_vm2 = vcmp.gt.f32.partialorder %v348_v47, 0.0 }
 0x17a   :  { %v358_v53 = vmul.f32 1.442695, %v350_v49  ;;  %vm355_vm3 = vcmp.gt.f32.partialorder %v350_v49, 0.0 }
 0x17b   :  { %1041 = vpow2.f32 %v356_v51 }
 0x17c   :  { %1043 = vpow2.f32 %v358_v53 }
 0x185   :  { %v1042_v54 = vpop.eup %1041 }
 0x186   :  { %v1044_v55 = vpop.eup %1043  ;;  %v846_v56 = vadd.f32 -1.0, %v1042_v54 }
 0x187   :  { %v847_v59 = vadd.f32 -1.0, %v1044_v55 }
 0x188   :  { %v362_v60 = vmul.f32 1.6732632, %v846_v56 }
 0x189   :  { %v363_v61 = vmul.f32 1.6732632, %v847_v59 }
 0x18a   :  { %v364_v62 = vsel %vm354_vm2, %v348_v47, %v362_v60 }
 0x18b   :  { %v365_v63 = vsel %vm355_vm3, %v350_v49, %v363_v61  ;;  %v366_v2 = vpack.c.bf16 %v364_v62, %v364_v62 }
 0x18c   :  { %v367_v0 = vpack.c.bf16 %v365_v63, %v365_v63 }
 0x18e   :  { %604 = vmatprep.mubr.bf16.mxu1 %v367_v0 }
 0x18f   :  { %605 = vmatmul.mubr.bf16.vlgmr.msra.gmra.mrb[0].mxu1 %v366_v2 }
 0x262   :  { %v606_v18 = vpop.f32.mrb[0].mxu1 }
 0x263   :  { %v607_v19 = vadd.f32 %v606_v18, %v405_v16  ;;  %v608_v20 = vpop.f32.mrb[1].mxu1 }
 0x264   :  { %v609_v21 = vadd.f32 %v608_v20, %v409_v17  ;;  %v610_v22 = vpop.f32.mrb[2].mxu1 }
 0x265   :  { %v615_v23 = vmul.f32 1.442695, %v607_v19  ;;  %v611_v24 = vpop.f32.mrb[3].mxu1  ;;  %vm613_vm4 = vcmp.gt.f32.partialorder %v607_v19, 0.0 }
 0x266   :  { %v617_v25 = vmul.f32 1.442695, %v609_v21  ;;  %vm614_vm5 = vcmp.gt.f32.partialorder %v609_v21, 0.0 }
 0x267   :  { %1045 = vpow2.f32 %v615_v23 }
 0x268   :  { %1047 = vpow2.f32 %v617_v25 }
 0x271   :  { %v1046_v26 = vpop.eup %1045 }
 0x272   :  { %v1048_v27 = vpop.eup %1047  ;;  %v880_v28 = vadd.f32 -1.0, %v1046_v26 }
 0x273   :  { %v881_v29 = vadd.f32 -1.0, %v1048_v27 }
 0x274   :  { %v621_v30 = vmul.f32 1.6732632, %v880_v28 }
 0x275   :  { %v622_v31 = vmul.f32 1.6732632, %v881_v29 }
 0x276   :  { %v623_v57 = vsel %vm613_vm4, %v607_v19, %v621_v30 }
 0x277   :  { %v624_v58 = vsel %vm614_vm5, %v609_v21, %v622_v31  ;;  %v625_v33 = vpack.c.bf16 %v623_v57, %v623_v57 }
 0x278   :  { %v626_v32 = vpack.c.bf16 %v624_v58, %v624_v58 }
 0x27a   :  { %787 = vmatprep.mubr.bf16.mxu0 %v626_v32 }
 0x27b   :  { %788 = vmatmul.mubr.bf16.vlgmr.msra.gmra.mrb[4].mxu0 %v625_v33 }
 0x34e   :  { %v915_v35 = vpop.f32.mrb[4].mxu0 }
 0x34f   :  { %v916_v36 = vpop.f32.mrb[5].mxu0 }
 0x350   :  { %v917_v39 = vadd.f32 %v916_v36, %v915_v35  ;;  %v918_v40 = vpop.f32.mrb[6].mxu0 }
 0x351   :  { %v919_v41 = vpop.f32.mrb[7].mxu0 }
 0x352   :  { %v802_v42 = vadd.f32 %v917_v39, %v898_v37 }
 0x354   :  { %v805_v43 = vsub.f32 %v802_v42, %v804_v38 }
 0x356   :  { %807 = vst.msk [vmem:[%s1408_s11] sm:$0xff] %vm806_vm6, %v805_v43 }

</bundles_post_ra>
